<compile_context>
chip_gen: v6e
topology: v6e:2x2x1
jax: 0.10.0
libtpu: 0.0.40
codegen_flags: <defaults>
</compile_context>

<pallas_src>
import math
import functools

import jax
import jax.numpy as jnp
from jax.experimental import pallas as pl
from jax.experimental.pallas import tpu as pltpu


# --------------------------------------------------------------------------
# Helpers
# --------------------------------------------------------------------------
def _round_up(n, m):
    return (n + m - 1) // m * m


def _row_tile(n, max_tile=512):
    """Largest 8-aligned row tile <= max_tile (n is already 8-aligned)."""
    return min(n, max_tile)


def _q_tile(s, max_tile=256):
    """8-aligned query tile (s is already 8-aligned)."""
    return min(s, max_tile)


def _vmem_limit_bytes():
    """Per-generation VMEM budget: ~48 MiB on 128-MiB parts, ~40 MiB on v7x."""
    cap = 128 * 1024 * 1024
    try:
        cap = getattr(pltpu.get_tpu_info(), "vmem_capacity_bytes", cap)
    except Exception:  # pragma: no cover - info unavailable (e.g. interpret)
        pass
    if cap <= 64 * 1024 * 1024:
        return 40 * 1024 * 1024
    return 48 * 1024 * 1024


def _spec(shape, index_map, buffers=None):
    """BlockSpec, optionally with an explicit pipeline buffer count."""
    if buffers is not None:
        return pl.BlockSpec(shape, index_map, pipeline_mode=pl.Buffered(buffers))
    return pl.BlockSpec(shape, index_map)


# --------------------------------------------------------------------------
# Pallas kernels
# --------------------------------------------------------------------------
def _qkv_proj_kernel(x_ref, w_ref, b_ref, q_ref, k_ref, v_ref, *, d_model):
    # x: [tn, D], w: [D, 3D], b: [1, 3D] (f32)  ->  q/k/v: [tn, D]
    y = jnp.dot(x_ref[...], w_ref[...], preferred_element_type=jnp.float32)
    y = y + b_ref[...]
    D = d_model
    q_ref[...] = y[:, :D].astype(q_ref.dtype)
    k_ref[...] = y[:, D:2 * D].astype(k_ref.dtype)
    v_ref[...] = y[:, 2 * D:].astype(v_ref.dtype)


def _linear_kernel(x_ref, w_ref, b_ref, o_ref):
    # x: [tn, Din], w: [Din, Dout], b: [1, Dout] (f32) -> o: [tn, Dout]
    y = jnp.dot(x_ref[...], w_ref[...], preferred_element_type=jnp.float32)
    o_ref[...] = (y + b_ref[...]).astype(o_ref.dtype)


def _mha_attn_kernel(q_ref, k_ref, v_ref, o_ref, acc_ref, *,
                     num_heads, d_k, scale, s_valid, s_padded, exp_dtype):
    # q block: [1, tq, D]; k/v blocks: [1, S_pad, D]; o block: [1, tq, D]
    # acc_ref: VMEM f32 scratch [tq, D] -- bounds per-head live ranges.
    q = q_ref[0] * scale               # fold 1/sqrt(d_k) into q once
    k = k_ref[0]                       # [S_pad, D]
    v = v_ref[0]                       # [S_pad, D]

    qk_dims = (((1,), (1,)), ((), ()))  # contract last dims == Q @ K^T

    need_mask = s_padded > s_valid
    if need_mask:
        col = jax.lax.broadcasted_iota(jnp.int32, (q.shape[0], s_padded), 1)
        key_valid = col < s_valid

    for h in range(num_heads):          # static unroll over heads
        lo = h * d_k
        qh = q[:, lo:lo + d_k]          # [tq, d_k]
        kh = k[:, lo:lo + d_k]          # [S_pad, d_k]
        vh = v[:, lo:lo + d_k]          # [S_pad, d_k]

        s = jax.lax.dot_general(qh, kh, qk_dims,
                                preferred_element_type=jnp.float32)  # [tq, S_pad]
        if need_mask:
            s = jnp.where(key_valid, s, -1e9)

        # Numerically-stable softmax; exp in bf16 on the bf16 path (EUP relief),
        # denominator accumulated in f32, normalize with an EUP reciprocal.
        m = jnp.max(s, axis=-1, keepdims=True)
        p = jnp.exp((s - m).astype(exp_dtype))
        denom = jnp.sum(p.astype(jnp.float32), axis=-1, keepdims=True)
        recip = pl.reciprocal(denom, approx=False)

        o_h = jnp.dot(p.astype(vh.dtype), vh,
                      preferred_element_type=jnp.float32)            # [tq, d_k]
        acc_ref[:, lo:lo + d_k] = o_h * recip                        # eager store

    # One lane-dense store: last dim is d_model (== combine_heads for free).
    o_ref[0] = acc_ref[...].astype(o_ref.dtype)


# --------------------------------------------------------------------------
# Pallas-call wrappers
# --------------------------------------------------------------------------
def pallas_qkv_proj(x, wqkv, bqkv, vmem_limit):
    """Fused Q/K/V projection.  x: [N, D], wqkv: [D, 3D], bqkv: [3D] (f32)."""
    N, D = x.shape
    tn = _row_tile(N)
    grid = (pl.cdiv(N, tn),)
    out = jax.ShapeDtypeStruct((N, D), x.dtype)
    esize = jnp.dtype(x.dtype).itemsize
    flops = 2 * N * D * 3 * D
    bytes_accessed = esize * (N * D + D * 3 * D + 3 * N * D) + 4 * 3 * D
    kernel = functools.partial(_qkv_proj_kernel, d_model=D)
    return pl.pallas_call(
        kernel,
        out_shape=(out, out, out),
        grid=grid,
        in_specs=[
            _spec((tn, D), lambda i: (i, 0)),
            _spec((D, 3 * D), lambda i: (0, 0), buffers=1),   # weight resident, 1 copy
            _spec((1, 3 * D), lambda i: (0, 0), buffers=1),   # bias resident, 1 copy
        ],
        out_specs=(
            _spec((tn, D), lambda i: (i, 0)),
            _spec((tn, D), lambda i: (i, 0)),
            _spec((tn, D), lambda i: (i, 0)),
        ),
        compiler_params=pltpu.CompilerParams(
            dimension_semantics=("parallel",),
            vmem_limit_bytes=vmem_limit),
        cost_estimate=pl.CostEstimate(flops=flops, transcendentals=0,
                                      bytes_accessed=bytes_accessed),
    )(x, wqkv, bqkv.reshape(1, 3 * D).astype(jnp.float32))


def pallas_linear(x, w, b, vmem_limit):
    """y = x @ w + b, row-tiled.  x: [N, Din], w: [Din, Dout], b: [Dout] (f32)."""
    N, D_in = x.shape
    D_out = w.shape[1]
    tn = _row_tile(N)
    grid = (pl.cdiv(N, tn),)
    esize = jnp.dtype(x.dtype).itemsize
    flops = 2 * N * D_in * D_out
    bytes_accessed = esize * (N * D_in + D_in * D_out + N * D_out) + 4 * D_out
    return pl.pallas_call(
        _linear_kernel,
        out_shape=jax.ShapeDtypeStruct((N, D_out), x.dtype),
        grid=grid,
        in_specs=[
            _spec((tn, D_in), lambda i: (i, 0)),
            _spec((D_in, D_out), lambda i: (0, 0), buffers=1),  # weight, 1 copy
            _spec((1, D_out), lambda i: (0, 0), buffers=1),     # bias, 1 copy
        ],
        out_specs=_spec((tn, D_out), lambda i: (i, 0)),
        compiler_params=pltpu.CompilerParams(
            dimension_semantics=("parallel",),
            vmem_limit_bytes=vmem_limit),
        cost_estimate=pl.CostEstimate(flops=flops, transcendentals=0,
                                      bytes_accessed=bytes_accessed),
    )(x, w, b.reshape(1, D_out).astype(jnp.float32))


def pallas_attention(q, k, v, num_heads, s_valid, vmem_limit):
    """Multi-head scaled dot-product attention in [B, S_pad, d_model] layout."""
    B, S, D = q.shape                       # S is the padded sequence length
    d_k = D // num_heads
    tq = _q_tile(S)
    grid = (B, pl.cdiv(S, tq))
    exp_dtype = jnp.bfloat16 if q.dtype == jnp.bfloat16 else jnp.float32
    kernel = functools.partial(
        _mha_attn_kernel, num_heads=num_heads, d_k=d_k,
        scale=1.0 / math.sqrt(d_k), s_valid=s_valid, s_padded=S,
        exp_dtype=exp_dtype)
    esize = jnp.dtype(q.dtype).itemsize
    flops = 4 * B * S * S * D                      # QK^T + PV
    transcendentals = B * num_heads * S * S        # exp
    bytes_accessed = esize * (4 * B * S * D)
    return pl.pallas_call(
        kernel,
        out_shape=jax.ShapeDtypeStruct((B, S, D), q.dtype),
        grid=grid,
        in_specs=[
            _spec((1, tq, D), lambda b, s: (b, s, 0)),
            _spec((1, S, D), lambda b, s: (b, 0, 0), buffers=1),  # K resident per batch
            _spec((1, S, D), lambda b, s: (b, 0, 0), buffers=1),  # V resident per batch
        ],
        out_specs=_spec((1, tq, D), lambda b, s: (b, s, 0)),
        scratch_shapes=[pltpu.VMEM((tq, D), jnp.float32)],
        compiler_params=pltpu.CompilerParams(
            dimension_semantics=("parallel", "parallel"),
            vmem_limit_bytes=vmem_limit),
        cost_estimate=pl.CostEstimate(flops=flops,
                                      transcendentals=transcendentals,
                                      bytes_accessed=bytes_accessed),
    )(q, k, v)


# --------------------------------------------------------------------------
# Forward pass matching the PyTorch MultiHeadAttention module (mask=None)
# --------------------------------------------------------------------------
def multi_head_attention(params, Q, K, V, num_heads, mask=None,
                         compute_dtype=None):
    assert mask is None  # TODO(synk): masked attention not implemented.
    in_dtype = Q.dtype
    B, S, D = Q.shape
    S_pad = _round_up(S, 8)
    vmem_limit = _vmem_limit_bytes()
    cd = in_dtype if compute_dtype is None else compute_dtype

    def prep(x):
        x = x.astype(cd)
        if S_pad != S:
            x = jnp.pad(x, ((0, 0), (0, S_pad - S), (0, 0)))
        return x

    self_attn = (Q is K) and (K is V)
    Qp = prep(Q)
    N = B * S_pad

    if self_attn:
        # Self-attention (ViT case): read the activation from HBM once.
        # Prefer pre-concatenated weights from params (built once at init).
        wqkv = params.get("wqkv")
        if wqkv is None:
            wqkv = jnp.concatenate([params["wq"], params["wk"], params["wv"]], axis=1)
        bqkv = params.get("bqkv")
        if bqkv is None:
            bqkv = jnp.concatenate([params["bq"], params["bk"], params["bv"]], axis=0)
        q, k, v = pallas_qkv_proj(Qp.reshape(N, D), wqkv.astype(cd), bqkv, vmem_limit)
    else:
        Kp, Vp = prep(K), prep(V)
        q = pallas_linear(Qp.reshape(N, D), params["wq"].astype(cd), params["bq"], vmem_limit)
        k = pallas_linear(Kp.reshape(N, D), params["wk"].astype(cd), params["bk"], vmem_limit)
        v = pallas_linear(Vp.reshape(N, D), params["wv"].astype(cd), params["bv"], vmem_limit)

    # Stay in [B, S_pad, D] layout — no split_heads / combine_heads transposes.
    q = q.reshape(B, S_pad, D)
    k = k.reshape(B, S_pad, D)
    v = v.reshape(B, S_pad, D)

    attn = pallas_attention(q, k, v, num_heads, s_valid=S, vmem_limit=vmem_limit)

    out = pallas_linear(attn.reshape(N, D), params["wo"].astype(cd), params["bo"],
                        vmem_limit)
    out = out.reshape(B, S_pad, D)
    if S_pad != S:
        out = out[:, :S, :]
    return out.astype(in_dtype)


# --------------------------------------------------------------------------
# Pure-JAX reference (mirrors the PyTorch forward exactly)
# --------------------------------------------------------------------------
def reference_mha(params, Q, K, V, num_heads):
    B, S, D = Q.shape
    d_k = D // num_heads

    def proj(x, w, b):
        y = x.reshape(B * S, D) @ w + b
        return y.reshape(B, S, num_heads, d_k).transpose(0, 2, 1, 3)

    q = proj(Q, params["wq"], params["bq"])
    k = proj(K, params["wk"], params["bk"])
    v = proj(V, params["wv"], params["bv"])
    scores = jnp.einsum("bhqd,bhkd->bhqk", q, k) / math.sqrt(d_k)
    probs = jax.nn.softmax(scores, axis=-1)
    attn = jnp.einsum("bhqk,bhkd->bhqd", probs, v)
    combined = attn.transpose(0, 2, 1, 3).reshape(B * S, D)
    return (combined @ params["wo"] + params["bo"]).reshape(B, S, D)


# --------------------------------------------------------------------------
# Main
# --------------------------------------------------------------------------
if __name__ == "__main__":
    B, S, d_model, num_heads = 2, 8, 32, 4

    key = jax.random.PRNGKey(0)
    keys = jax.random.split(key, 12)

    def init_w(k):
        return jax.random.normal(k, (d_model, d_model), jnp.float32) * 0.02

    def init_b(k):
        return jax.random.normal(k, (d_model,), jnp.float32) * 0.02

    params = {
        "wq": init_w(keys[0]), "bq": init_b(keys[1]),
        "wk": init_w(keys[2]), "bk": init_b(keys[3]),
        "wv": init_w(keys[4]), "bv": init_b(keys[5]),
        "wo": init_w(keys[6]), "bo": init_b(keys[7]),
    }
    # Pre-concatenate the fused QKV weights ONCE at init (not per forward).
    params["wqkv"] = jnp.concatenate([params["wq"], params["wk"], params["wv"]], axis=1)
    params["bqkv"] = jnp.concatenate([params["bq"], params["bk"], params["bv"]], axis=0)

    Q = jax.random.normal(keys[8], (B, S, d_model), jnp.float32)
    K = jax.random.normal(keys[9], (B, S, d_model), jnp.float32)
    V = jax.random.normal(keys[10], (B, S, d_model), jnp.float32)

    # Path 1: self-attention (fused QKV projection), the ViT usage.
    out_self = jax.block_until_ready(
        multi_head_attention(params, Q, Q, Q, num_heads))
    ref_self = reference_mha(params, Q, Q, Q, num_heads)

    # Path 2: distinct Q/K/V sources (general module semantics).
    out_gen = jax.block_until_ready(
        multi_head_attention(params, Q, K, V, num_heads))
    ref_gen = reference_mha(params, Q, K, V, num_heads)

    # Path 3: non-8-divisible sequence length (exercises S padding + key mask).
    S_r = 10
    Qr = jax.random.normal(keys[11], (B, S_r, d_model), jnp.float32)
    out_rag = jax.block_until_ready(
        multi_head_attention(params, Qr, Qr, Qr, num_heads))
    ref_rag = reference_mha(params, Qr, Qr, Qr, num_heads)

    # Path 4: bf16 compute path (MXU + exp in bf16, f32 accumulation).
    out_bf16 = jax.block_until_ready(
        multi_head_attention(params, Q, Q, Q, num_heads,
                             compute_dtype=jnp.bfloat16))

    assert out_self.shape == (B, S, d_model)
    assert out_gen.shape == (B, S, d_model)
    assert out_rag.shape == (B, S_r, d_model)
    assert out_bf16.shape == (B, S, d_model)
    assert jnp.allclose(out_self, ref_self, atol=2e-3, rtol=2e-2), "self-attn mismatch"
    assert jnp.allclose(out_gen, ref_gen, atol=2e-3, rtol=2e-2), "general mismatch"
    assert jnp.allclose(out_rag, ref_rag, atol=2e-3, rtol=2e-2), "ragged-S mismatch"
    assert jnp.allclose(out_bf16, ref_self, atol=2e-2, rtol=2e-1), "bf16 path mismatch"

    print("KERNEL_OK")
</pallas_src>

<mosaic_0001>
module attributes {stable_mosaic.version = 11 : i64} {
  func.func @_qkv_proj_kernel(%arg0: i32, %arg1: memref<16x32xf32, #tpu.memory_space<vmem>>, %arg2: memref<32x96xf32, #tpu.memory_space<vmem>>, %arg3: memref<1x96xf32, #tpu.memory_space<vmem>>, %arg4: memref<16x32xf32, #tpu.memory_space<vmem>>, %arg5: memref<16x32xf32, #tpu.memory_space<vmem>>, %arg6: memref<16x32xf32, #tpu.memory_space<vmem>>) attributes {dimension_semantics = [#tpu.dimension_semantics<parallel>], iteration_bounds = array<i64: 1>, scalar_prefetch = 0 : i64, scratch_operands = 0 : i64, tpu.core_type = #tpu.core_type<tc>, window_params = [{transform_indices = @transform_0, window_bounds = array<i64: 16, 32>}, {pipeline_mode = #tpu.pipeline_mode<synchronous>, transform_indices = @transform_1, window_bounds = array<i64: 32, 96>}, {pipeline_mode = #tpu.pipeline_mode<synchronous>, transform_indices = @transform_2, window_bounds = array<i64: 1, 96>}, {transform_indices = @transform_3, window_bounds = array<i64: 16, 32>}, {transform_indices = @transform_4, window_bounds = array<i64: 16, 32>}, {transform_indices = @transform_5, window_bounds = array<i64: 16, 32>}]} {
    %c0 = arith.constant 0 : index
    %c0_0 = arith.constant 0 : index
    %0 = vector.load %arg1[%c0, %c0_0] : memref<16x32xf32, #tpu.memory_space<vmem>>, vector<16x32xf32>
    %c0_1 = arith.constant 0 : index
    %c0_2 = arith.constant 0 : index
    %1 = vector.load %arg2[%c0_1, %c0_2] : memref<32x96xf32, #tpu.memory_space<vmem>>, vector<32x96xf32>
    %cst = arith.constant dense<0.000000e+00> : vector<16x96xf32>
    %2 = tpu.matmul %0, %1, %cst {dimension_numbers = #tpu.dot_dimension_numbers<[1], [0], [0], [1], [0, 0, 1, 1], [], []>} : vector<16x32xf32>, vector<32x96xf32>, vector<16x96xf32> -> vector<16x96xf32>
    %c0_3 = arith.constant 0 : index
    %c0_4 = arith.constant 0 : index
    %3 = vector.load %arg3[%c0_3, %c0_4] : memref<1x96xf32, #tpu.memory_space<vmem>>, vector<1x96xf32>
    %4 = vector.broadcast %3 : vector<1x96xf32> to vector<16x96xf32>
    %5 = arith.addf %2, %4 : vector<16x96xf32>
    %6 = vector.extract_strided_slice %5 {offsets = [0, 0], sizes = [16, 32], strides = [1, 1]} : vector<16x96xf32> to vector<16x32xf32>
    %c0_5 = arith.constant 0 : index
    %c0_6 = arith.constant 0 : index
    %7 = vector.load %arg4[%c0_5, %c0_6] : memref<16x32xf32, #tpu.memory_space<vmem>>, vector<16x32xf32>
    tpu.vector_store %arg4[%c0_5, %c0_6], %6 {strides = array<i32>} : memref<16x32xf32, #tpu.memory_space<vmem>>, vector<16x32xf32>,
    %8 = vector.extract_strided_slice %5 {offsets = [0, 32], sizes = [16, 32], strides = [1, 1]} : vector<16x96xf32> to vector<16x32xf32>
    %c0_7 = arith.constant 0 : index
    %c0_8 = arith.constant 0 : index
    %9 = vector.load %arg5[%c0_7, %c0_8] : memref<16x32xf32, #tpu.memory_space<vmem>>, vector<16x32xf32>
    tpu.vector_store %arg5[%c0_7, %c0_8], %8 {strides = array<i32>} : memref<16x32xf32, #tpu.memory_space<vmem>>, vector<16x32xf32>,
    %10 = vector.extract_strided_slice %5 {offsets = [0, 64], sizes = [16, 32], strides = [1, 1]} : vector<16x96xf32> to vector<16x32xf32>
    %c0_9 = arith.constant 0 : index
    %c0_10 = arith.constant 0 : index
    %11 = vector.load %arg6[%c0_9, %c0_10] : memref<16x32xf32, #tpu.memory_space<vmem>>, vector<16x32xf32>
    tpu.vector_store %arg6[%c0_9, %c0_10], %10 {strides = array<i32>} : memref<16x32xf32, #tpu.memory_space<vmem>>, vector<16x32xf32>,
    return
  }
  func.func @transform_0(%arg0: i32) -> (i32, i32) {
    %c0_i32 = arith.constant 0 : i32
    %c0_i32_0 = arith.constant 0 : i32
    return %arg0, %c0_i32 : i32, i32
  }
  func.func @transform_1(%arg0: i32) -> (i32, i32) {
    %c0_i32 = arith.constant 0 : i32
    %c0_i32_0 = arith.constant 0 : i32
    %c0_i32_1 = arith.constant 0 : i32
    return %c0_i32, %c0_i32_0 : i32, i32
  }
  func.func @transform_2(%arg0: i32) -> (i32, i32) {
    %c0_i32 = arith.constant 0 : i32
    %c0_i32_0 = arith.constant 0 : i32
    %c0_i32_1 = arith.constant 0 : i32
    return %c0_i32, %c0_i32_0 : i32, i32
  }
  func.func @transform_3(%arg0: i32) -> (i32, i32) {
    %c0_i32 = arith.constant 0 : i32
    %c0_i32_0 = arith.constant 0 : i32
    return %arg0, %c0_i32 : i32, i32
  }
  func.func @transform_4(%arg0: i32) -> (i32, i32) {
    %c0_i32 = arith.constant 0 : i32
    %c0_i32_0 = arith.constant 0 : i32
    return %arg0, %c0_i32 : i32, i32
  }
  func.func @transform_5(%arg0: i32) -> (i32, i32) {
    %c0_i32 = arith.constant 0 : i32
    %c0_i32_0 = arith.constant 0 : i32
    return %arg0, %c0_i32 : i32, i32
  }
}

</mosaic_0001>

<bundles_post_ra>
// kernel: tpu_custom_call.1
= control target key start
LH: loop header
LB: loop body
LE: loop exit
PB: predicated region body
PF: predicated region fallthrough
CT: control target
= control target key end

     0   :  { %11 = vsyncpa [#allocation3], 0  ;;  %s428_s0 = inlined_call_operand.hbm [shape: f32[16,32], index: 0, kind: input, shape index: {}]   ;;  %s429_s1 = inlined_call_operand.hbm [shape: f32[32,96], index: 1, kind: input, shape index: {}]   ;;  %s430_s2 = inlined_call_operand.vmem [shape: f32[1,96], index: 2, kind: input, shape index: {}]   ;;  %s431_s3 = inlined_call_operand.hbm [shape: f32[16,32], index: 3, kind: output, shape index: {0}]   ;;  %s432_s4 = inlined_call_operand.hbm [shape: f32[16,32], index: 4, kind: output, shape index: {1}]   ;;  %s433_s5 = inlined_call_operand.hbm [shape: f32[16,32], index: 5, kind: output, shape index: {2}]  }
   0x1   :  { %12 = vsyncpa [#allocation6], 0 }
   0x2   :  { %13 = vsyncpa [#allocation4], 0 }
   0x3   :  { %14 = vsyncpa [#allocation9], 0  ;;  %s348_s18 = smov [#allocation2]  }
   0x4   :  { %s20_s19 = sshll.u32 %s348_s18, 4  ;;  %s21_s19 = int_to_ptr.vmem [resolvable:$true] %s20_s19 }
   0x5   :  { %s248_s20 = scalar_lea.vmem %s21_s19, 256  ;;  %p253_p1 = scmp.lt.s32.totalorder %s21_s19, %s21_s19 }
   0x6   :  { %p249_p0 = scmp.ne.s32.totalorder %s21_s19, %s248_s20  ;;  %p254_p2 = scmp.lt.s32.totalorder %s248_s20, %s248_s20 }
   0x8   :  { %p255_p3 = por %p254_p2, %p253_p1 }
   0xa   :  { %p256_p4 = pnand %p255_p3, %p249_p0 }
   0xc   :  { %259 = shalt.err (!%p256_p4)
}
   0xd   :  { %s349_s21 = smov 128   ;;  %s350_s22 = smov 8  }
   0xe   :  { %26 = dma.hbm_to_vmem [thread:$0]  %s428_s0, 256, %s21_s19, [#allocation3], %s349_s21, %s349_s21, %s350_s22  }
   0xf   :  { %s351_s25 = smov [#allocation5]  }
  0x10   :  { %s32_s26 = sshll.u32 %s351_s25, 4  ;;  %s33_s26 = int_to_ptr.vmem [resolvable:$true] %s32_s26 }
  0x11   :  { %s268_s27 = scalar_lea.vmem %s33_s26, 512  ;;  %p273_p6 = scmp.lt.s32.totalorder %s33_s26, %s33_s26 }
  0x12   :  { %p269_p5 = scmp.ne.s32.totalorder %s33_s26, %s268_s27  ;;  %p274_p7 = scmp.lt.s32.totalorder %s268_s27, %s268_s27 }
  0x14   :  { %p275_p8 = por %p274_p7, %p273_p6 }
  0x16   :  { %p276_p9 = pnand %p275_p8, %p269_p5 }
  0x18   :  { %279 = shalt.err (!%p276_p9)
}
  0x19   :  { %38 = dma.hbm_to_vmem [thread:$0]  %s429_s1, 512, %s33_s26, [#allocation6], %s349_s21, %s349_s21, %s350_s22  }
  0x1a   :  { %340 = dma.done.wait [#allocation3], 256  }
  0x1b   :  { %341 = vsyncadd [#allocation3], 4294967040 }
  0x1c   :  { %342 = dma.done.wait [#allocation6], 512  }
  0x1d   :  { %343 = vsyncadd [#allocation6], 4294966784  ;;  %vm60_vm0 = vcmask 261120   ;;  %v52_v0 = vld [vmem:[#allocation5 + $0x18] sm:$0xff]  ;;  %v51_v1 = vld [vmem:[#allocation5 + $0x10] sm:$0xff]  ;;  %s352_s30 = smov [#allocation7]  }
  0x1e   :  { %220 = vmatprep.subr.mxu0 %v52_v0  ;;  %v47_v2 = vld [vmem:[#allocation2] sm:$0xff]  ;;  %v50_v3 = vld [vmem:[#allocation5 + $0x8] sm:$0xff]  ;;  %v49_v4 = vld [vmem:[#allocation5] sm:$0xff]  ;;  %s167_s6 = sshll.u32 %s352_s30, 4  ;;  %s353_s7 = smov 64   ;;  %s168_s6 = int_to_ptr.vmem [resolvable:$true] %s167_s6 }
  0x1f   :  { %221 = vmatpush3.msra.mxu0 %v52_v0  ;;  %228 = vmatprep.mubr.msk.f32.mxu0 %vm60_vm0, %v47_v2  ;;  %v48_v5 = vld [vmem:[#allocation2 + $0x8] sm:$0xff]  ;;  %v211_v6 = vld [vmem:[%s430_s2] ss:$0 sm:$0xff]  ;;  %s354_s8 = smov 96   ;;  %s280_s9 = scalar_lea.vmem %s168_s6, 256 }
  0x20   :  { %222 = vmatprep.subr.mxu0 %v51_v1  ;;  %p281_p10 = scmp.ne.s32.totalorder %s168_s6, %s280_s9  ;;  %p285_p11 = scmp.lt.s32.totalorder %s168_s6, %s168_s6 }
  0x21   :  { %223 = vmatpush3.msra.mxu0 %v51_v1  ;;  %p286_p12 = scmp.lt.s32.totalorder %s280_s9, %s280_s9 }
  0x22   :  { %224 = vmatprep.subr.mxu0 %v50_v3 }
  0x23   :  { %225 = vmatpush3.msra.mxu0 %v50_v3  ;;  %p287_p13 = por %p286_p12, %p285_p11 }
  0x24   :  { %226 = vmatprep.subr.mxu0 %v49_v4 }
  0x25   :  { %227 = vmatpush3.msra.mxu0 %v49_v4  ;;  %p288_p0 = pnand %p287_p13, %p281_p10 }
  0x26   :  { %229 = vmatmul.mubr.msk.f32.vlgmr.msra.gmra.mxu0 %vm60_vm0, %v48_v5 }
  0xe6   :  { %v230_v7 = vpop.f32.mrf.mxu0 }
  0xe7   :  { %v139_v8 = vadd.f32 %v230_v7, %v211_v6 }
  0xe8   :  { %v133_v9 = vpop.f32.mrf.mxu0 }
  0xe9   :  { %143 = vst.msk [vmem:[#allocation7 + $0x8] sm:$0xff] %vm60_vm0, %v139_v8  ;;  %v134_v10 = vadd.f32 %v211_v6, %v133_v9 }
  0xeb   :  { %142 = vst.msk [vmem:[#allocation7] sm:$0xff] %vm60_vm0, %v134_v10  ;;  %154 = vrot.lane.b32.xlu1 %v134_v10, %s353_s7  ;;  %146 = vrot.lane.b32.xlu0 %v134_v10, %s354_s8 }
  0xec   :  { %291 = shalt.err (!%p288_p0)
}
  0xed   :  { %173 = dma.vmem_to_hbm [thread:$0]  %s168_s6, 256, %s431_s3, [#allocation4], %s349_s21, %s349_s21, %s350_s22  }
  0xee   :  { %s355_s11 = smov [#allocation8]   ;;  %s356_s13 = smov [#allocation10]  }
  0xef   :  { %156 = vrot.lane.b32.xlu1 %v139_v8, %s353_s7  ;;  %148 = vrot.lane.b32.xlu0 %v139_v8, %s354_s8  ;;  %s179_s12 = sshll.u32 %s355_s11, 4  ;;  %s191_s14 = sshll.u32 %s356_s13, 4  ;;  %s180_s12 = int_to_ptr.vmem [resolvable:$true] %s179_s12  ;;  %s192_s14 = int_to_ptr.vmem [resolvable:$true] %s191_s14 }
  0xf0   :  { %s300_s3 = scalar_lea.vmem %s180_s12, 256  ;;  %p305_p2 = scmp.lt.s32.totalorder %s180_s12, %s180_s12 }
  0xf1   :  { %p301_p1 = scmp.ne.s32.totalorder %s180_s12, %s300_s3  ;;  %p306_p3 = scmp.lt.s32.totalorder %s300_s3, %s300_s3 }
  0xf3   :  { %p307_p4 = por %p306_p3, %p305_p2 }
  0xf5   :  { %p308_p5 = pnand %p307_p4, %p301_p1 }
 0x15d   :  { %v155_v11 = vpop.permute.xlu1 %154  ;;  %v147_v12 = vpop.permute.xlu0 %146 }
 0x15e   :  { %160 = vst.msk [vmem:[#allocation10] sm:$0xff] %vm60_vm0, %v155_v11  ;;  %152 = vst.msk [vmem:[#allocation8] sm:$0xff] %vm60_vm0, %v147_v12 }
 0x161   :  { %v157_v13 = vpop.permute.xlu1 %156  ;;  %v149_v14 = vpop.permute.xlu0 %148 }
 0x162   :  { %161 = vst.msk [vmem:[#allocation10 + $0x8] sm:$0xff] %vm60_vm0, %v157_v13  ;;  %153 = vst.msk [vmem:[#allocation8 + $0x8] sm:$0xff] %vm60_vm0, %v149_v14 }
 0x163   :  { %311 = shalt.err (!%p308_p5)
}
 0x164   :  { %185 = dma.vmem_to_hbm [thread:$0]  %s180_s12, 256, %s432_s4, [#allocation9], %s349_s21, %s349_s21, %s350_s22  }
 0x165   :  { %s320_s17 = scalar_lea.vmem %s192_s14, 256  ;;  %p325_p7 = scmp.lt.s32.totalorder %s192_s14, %s192_s14 }
 0x166   :  { %p321_p6 = scmp.ne.s32.totalorder %s192_s14, %s320_s17  ;;  %p326_p8 = scmp.lt.s32.totalorder %s320_s17, %s320_s17 }
 0x168   :  { %p327_p9 = por %p326_p8, %p325_p7 }
 0x16a   :  { %p328_p10 = pnand %p327_p9, %p321_p6 }
 0x16c   :  { %331 = shalt.err (!%p328_p10)
}
 0x16d   :  { %197 = dma.vmem_to_hbm [thread:$0]  %s192_s14, 256, %s433_s5, [#allocation9], %s349_s21, %s349_s21, %s350_s22  }
 0x16e   :  { %344 = dma.done.wait [#allocation4], 256  }
 0x16f   :  { %345 = vsyncadd [#allocation4], 4294967040 }
 0x170   :  { %346 = dma.done.wait [#allocation9], 512  }
 0x171   :  { %347 = vsyncadd [#allocation9], 4294966784 }
 0x172   :  { %207 = vsyncpa [#allocation3], 1 }
 0x173   :  { %208 = vsyncpa [#allocation6], 1 }
 0x174   :  { %209 = vsyncpa [#allocation4], 1 }
 0x175   :  { %210 = vsyncpa [#allocation9], 1 }

</bundles_post_ra>
